<compile_context>
chip_gen: v5e
topology: v5e:2x2
jax: 0.10.0
libtpu: 0.0.40
codegen_flags: <defaults>
</compile_context>

<pallas_src>
import jax
import jax.numpy as jnp
from jax.experimental import pallas as pl
from jax.experimental.pallas import tpu as pltpu


def _round_up(x, m):
    return (x + m - 1) // m * m


def _gate_combine_kernel(f_ref, a_ref, q_ref,
                         wf_ref, bf_ref,            # f_proj: (H_pad, M_pad), (1, M_pad)
                         wa_ref, ba_ref,            # a_proj: (H_pad, M_pad), (1, M_pad)
                         wfa_ref, waa_ref,          # f_att / a_att rows: (1, M_pad)
                         att_b_ref,                 # SMEM (2,): [bf_att, ba_att]
                         out_ref):
    f = f_ref[...]
    a = a_ref[...]
    q = q_ref[...]

    # f branch: proj -> (dropout == identity at inference) -> gate
    f_proj = jnp.dot(f + q, wf_ref[...], preferred_element_type=jnp.float32)
    f_proj = f_proj + bf_ref[...]
    # N=1 "matmul" as VPU broadcast-mul + lane reduction (keeps MXU free).
    f_logit = jnp.sum(f_proj * wfa_ref[...], axis=-1, keepdims=True) + att_b_ref[0]
    f_g = jax.nn.sigmoid(f_logit)                                   # (TB, 1)

    # a branch
    a_proj = jnp.dot(a + q, wa_ref[...], preferred_element_type=jnp.float32)
    a_proj = a_proj + ba_ref[...]
    a_logit = jnp.sum(a_proj * waa_ref[...], axis=-1, keepdims=True) + att_b_ref[1]
    a_g = jax.nn.sigmoid(a_logit)                                   # (TB, 1)

    # fa_comb = f_g * f + a_g * a + q   (gates broadcast over hidden)
    out_ref[...] = f_g * f + a_g * a + q


def gate_combine_three(f, a, q, params, *, tb=128):
    """f, a, q: (B, hidden) float32. params: dict of pre-transposed weights."""
    B, H = f.shape
    M = params["wf"].shape[1]

    H_pad = _round_up(H, 128)
    M_pad = _round_up(M, 128)
    TB = min(tb, _round_up(B, 8))
    B_pad = _round_up(B, TB)

    def pad2(x, rows, cols):
        return jnp.pad(x, ((0, rows - x.shape[0]), (0, cols - x.shape[1])))

    # Zero-padding is exact here: padded input lanes hit zero weight rows,
    # padded M columns get zero weights + zero bias, padded output lanes are 0.
    f_p = pad2(f, B_pad, H_pad)
    a_p = pad2(a, B_pad, H_pad)
    q_p = pad2(q, B_pad, H_pad)
    wf = pad2(params["wf"], H_pad, M_pad)
    wa = pad2(params["wa"], H_pad, M_pad)
    bf = pad2(params["bf"], 1, M_pad)
    ba = pad2(params["ba"], 1, M_pad)
    # attention weights stored lane-dense as (1, M_pad) rows
    wfa = pad2(params["wf_att"].T, 1, M_pad)
    waa = pad2(params["wa_att"].T, 1, M_pad)
    att_b = jnp.concatenate([params["bf_att"].reshape(-1),
                             params["ba_att"].reshape(-1)]).astype(jnp.float32)

    grid = (B_pad // TB,)
    act_spec = pl.BlockSpec((TB, H_pad), lambda i: (i, 0))
    w_spec = pl.BlockSpec((H_pad, M_pad), lambda i: (0, 0))
    row_spec = pl.BlockSpec((1, M_pad), lambda i: (0, 0))
    smem_spec = pl.BlockSpec(memory_space=pltpu.MemorySpace.SMEM)

    flops = 2 * (2 * B_pad * H_pad * M_pad) + 8 * B_pad * H_pad
    bytes_accessed = 4 * (4 * B_pad * H_pad + 2 * H_pad * M_pad + 4 * M_pad + 2)

    out = pl.pallas_call(
        _gate_combine_kernel,
        out_shape=jax.ShapeDtypeStruct((B_pad, H_pad), jnp.float32),
        grid=grid,
        in_specs=[act_spec, act_spec, act_spec,
                  w_spec, row_spec,
                  w_spec, row_spec,
                  row_spec, row_spec,
                  smem_spec],
        out_specs=act_spec,
        compiler_params=pltpu.CompilerParams(
            dimension_semantics=("parallel",)),
        cost_estimate=pl.CostEstimate(
            flops=flops, transcendentals=2 * B_pad,
            bytes_accessed=bytes_accessed),
    )(f_p, a_p, q_p, wf, bf, wa, ba, wfa, waa, att_b)

    return out[:B, :H]


def init_params(key, hidden, mid):
    """Deterministic synthetic parameters (PyTorch nn.Linear shapes, transposed)."""
    ks = jax.random.split(key, 8)
    scale_h = 1.0 / jnp.sqrt(hidden)
    scale_m = 1.0 / jnp.sqrt(mid)
    return {
        # nn.Linear(hidden, mid): weight (mid, hidden) -> stored as (hidden, mid)
        "wf": jax.random.uniform(ks[0], (hidden, mid), jnp.float32, -scale_h, scale_h),
        "bf": jax.random.uniform(ks[1], (1, mid), jnp.float32, -scale_h, scale_h),
        "wa": jax.random.uniform(ks[2], (hidden, mid), jnp.float32, -scale_h, scale_h),
        "ba": jax.random.uniform(ks[3], (1, mid), jnp.float32, -scale_h, scale_h),
        # nn.Linear(mid, 1): weight (1, mid) -> stored as (mid, 1)
        "wf_att": jax.random.uniform(ks[4], (mid, 1), jnp.float32, -scale_m, scale_m),
        "bf_att": jax.random.uniform(ks[5], (1, 1), jnp.float32, -scale_m, scale_m),
        "wa_att": jax.random.uniform(ks[6], (mid, 1), jnp.float32, -scale_m, scale_m),
        "ba_att": jax.random.uniform(ks[7], (1, 1), jnp.float32, -scale_m, scale_m),
    }


def reference(f, a, q, p):
    """Pure-JAX reference mirroring the PyTorch forward (eval mode)."""
    f_proj = (f + q) @ p["wf"] + p["bf"]
    f_g = jax.nn.sigmoid(f_proj @ p["wf_att"] + p["bf_att"])
    a_proj = (a + q) @ p["wa"] + p["ba"]
    a_g = jax.nn.sigmoid(a_proj @ p["wa_att"] + p["ba_att"])
    return f_g * f + a_g * a + q


if __name__ == "__main__":
    B, HIDDEN, MID = 8, 32, 16

    key = jax.random.PRNGKey(0)
    kf, ka, kq, kp = jax.random.split(key, 4)
    f = jax.random.normal(kf, (B, HIDDEN), jnp.float32)
    a = jax.random.normal(ka, (B, HIDDEN), jnp.float32)
    q = jax.random.normal(kq, (B, HIDDEN), jnp.float32)
    params = init_params(kp, HIDDEN, MID)

    out = gate_combine_three(f, a, q, params)
    out = jax.block_until_ready(out)

    ref = reference(f, a, q, params)
    assert out.shape == (B, HIDDEN)
    assert jnp.allclose(out, ref, atol=1e-5, rtol=1e-5), "mismatch vs reference"

    print("KERNEL_OK")
</pallas_src>

<mosaic_0001>
module attributes {stable_mosaic.version = 11 : i64} {
  func.func @_gate_combine_kernel(%arg0: i32, %arg1: memref<8x128xf32, #tpu.memory_space<vmem>>, %arg2: memref<8x128xf32, #tpu.memory_space<vmem>>, %arg3: memref<8x128xf32, #tpu.memory_space<vmem>>, %arg4: memref<128x128xf32, #tpu.memory_space<vmem>>, %arg5: memref<1x128xf32, #tpu.memory_space<vmem>>, %arg6: memref<128x128xf32, #tpu.memory_space<vmem>>, %arg7: memref<1x128xf32, #tpu.memory_space<vmem>>, %arg8: memref<1x128xf32, #tpu.memory_space<vmem>>, %arg9: memref<1x128xf32, #tpu.memory_space<vmem>>, %arg10: memref<2xf32, #tpu.memory_space<smem>>, %arg11: memref<8x128xf32, #tpu.memory_space<vmem>>) attributes {dimension_semantics = [#tpu.dimension_semantics<parallel>], iteration_bounds = array<i64: 1>, scalar_prefetch = 0 : i64, scratch_operands = 0 : i64, tpu.core_type = #tpu.core_type<tc>, window_params = [{transform_indices = @transform_0, window_bounds = array<i64: 8, 128>}, {transform_indices = @transform_1, window_bounds = array<i64: 8, 128>}, {transform_indices = @transform_2, window_bounds = array<i64: 8, 128>}, {pipeline_mode = #tpu.pipeline_mode<synchronous>, transform_indices = @transform_3, window_bounds = array<i64: 128, 128>}, {pipeline_mode = #tpu.pipeline_mode<synchronous>, transform_indices = @transform_4, window_bounds = array<i64: 1, 128>}, {pipeline_mode = #tpu.pipeline_mode<synchronous>, transform_indices = @transform_5, window_bounds = array<i64: 128, 128>}, {pipeline_mode = #tpu.pipeline_mode<synchronous>, transform_indices = @transform_6, window_bounds = array<i64: 1, 128>}, {pipeline_mode = #tpu.pipeline_mode<synchronous>, transform_indices = @transform_7, window_bounds = array<i64: 1, 128>}, {pipeline_mode = #tpu.pipeline_mode<synchronous>, transform_indices = @transform_8, window_bounds = array<i64: 1, 128>}, {transform_indices = @transform_9, window_bounds = array<i64: 2>}, {transform_indices = @transform_10, window_bounds = array<i64: 8, 128>}]} {
    %c0 = arith.constant 0 : index
    %c0_0 = arith.constant 0 : index
    %0 = vector.load %arg1[%c0, %c0_0] : memref<8x128xf32, #tpu.memory_space<vmem>>, vector<8x128xf32>
    %c0_1 = arith.constant 0 : index
    %c0_2 = arith.constant 0 : index
    %1 = vector.load %arg2[%c0_1, %c0_2] : memref<8x128xf32, #tpu.memory_space<vmem>>, vector<8x128xf32>
    %c0_3 = arith.constant 0 : index
    %c0_4 = arith.constant 0 : index
    %2 = vector.load %arg3[%c0_3, %c0_4] : memref<8x128xf32, #tpu.memory_space<vmem>>, vector<8x128xf32>
    %3 = arith.addf %0, %2 : vector<8x128xf32>
    %c0_5 = arith.constant 0 : index
    %c0_6 = arith.constant 0 : index
    %4 = vector.load %arg4[%c0_5, %c0_6] : memref<128x128xf32, #tpu.memory_space<vmem>>, vector<128x128xf32>
    %cst = arith.constant dense<0.000000e+00> : vector<8x128xf32>
    %5 = tpu.matmul %3, %4, %cst {dimension_numbers = #tpu.dot_dimension_numbers<[1], [0], [0], [1], [0, 0, 1, 1], [], []>} : vector<8x128xf32>, vector<128x128xf32>, vector<8x128xf32> -> vector<8x128xf32>
    %c0_7 = arith.constant 0 : index
    %c0_8 = arith.constant 0 : index
    %6 = vector.load %arg5[%c0_7, %c0_8] : memref<1x128xf32, #tpu.memory_space<vmem>>, vector<1x128xf32>
    %7 = vector.broadcast %6 : vector<1x128xf32> to vector<8x128xf32>
    %8 = arith.addf %5, %7 : vector<8x128xf32>
    %c0_9 = arith.constant 0 : index
    %c0_10 = arith.constant 0 : index
    %9 = vector.load %arg8[%c0_9, %c0_10] : memref<1x128xf32, #tpu.memory_space<vmem>>, vector<1x128xf32>
    %10 = vector.broadcast %9 : vector<1x128xf32> to vector<8x128xf32>
    %11 = arith.mulf %8, %10 : vector<8x128xf32>
    %cst_11 = arith.constant dense<0.000000e+00> : vector<8xf32>
    %12 = vector.multi_reduction <add>, %11, %cst_11 [1] : vector<8x128xf32> to vector<8xf32>
    %13 = vector.shape_cast %12 : vector<8xf32> to vector<8x1xf32>
    %c0_12 = arith.constant 0 : index
    %14 = memref.load %arg10[%c0_12] : memref<2xf32, #tpu.memory_space<smem>>
    %15 = vector.broadcast %14 : f32 to vector<8x1xf32>
    %16 = arith.addf %13, %15 : vector<8x1xf32>
    %17 = arith.negf %16 : vector<8x1xf32>
    %18 = math.exp %17 : vector<8x1xf32>
    %cst_13 = arith.constant 1.000000e+00 : f32
    %19 = vector.broadcast %cst_13 : f32 to vector<8x1xf32>
    %20 = arith.addf %19, %18 : vector<8x1xf32>
    %21 = arith.divf %19, %20 : vector<8x1xf32>
    %22 = arith.addf %1, %2 : vector<8x128xf32>
    %c0_14 = arith.constant 0 : index
    %c0_15 = arith.constant 0 : index
    %23 = vector.load %arg6[%c0_14, %c0_15] : memref<128x128xf32, #tpu.memory_space<vmem>>, vector<128x128xf32>
    %cst_16 = arith.constant dense<0.000000e+00> : vector<8x128xf32>
    %24 = tpu.matmul %22, %23, %cst_16 {dimension_numbers = #tpu.dot_dimension_numbers<[1], [0], [0], [1], [0, 0, 1, 1], [], []>} : vector<8x128xf32>, vector<128x128xf32>, vector<8x128xf32> -> vector<8x128xf32>
    %c0_17 = arith.constant 0 : index
    %c0_18 = arith.constant 0 : index
    %25 = vector.load %arg7[%c0_17, %c0_18] : memref<1x128xf32, #tpu.memory_space<vmem>>, vector<1x128xf32>
    %26 = vector.broadcast %25 : vector<1x128xf32> to vector<8x128xf32>
    %27 = arith.addf %24, %26 : vector<8x128xf32>
    %c0_19 = arith.constant 0 : index
    %c0_20 = arith.constant 0 : index
    %28 = vector.load %arg9[%c0_19, %c0_20] : memref<1x128xf32, #tpu.memory_space<vmem>>, vector<1x128xf32>
    %29 = vector.broadcast %28 : vector<1x128xf32> to vector<8x128xf32>
    %30 = arith.mulf %27, %29 : vector<8x128xf32>
    %cst_21 = arith.constant dense<0.000000e+00> : vector<8xf32>
    %31 = vector.multi_reduction <add>, %30, %cst_21 [1] : vector<8x128xf32> to vector<8xf32>
    %32 = vector.shape_cast %31 : vector<8xf32> to vector<8x1xf32>
    %c1 = arith.constant 1 : index
    %33 = memref.load %arg10[%c1] : memref<2xf32, #tpu.memory_space<smem>>
    %34 = vector.broadcast %33 : f32 to vector<8x1xf32>
    %35 = arith.addf %32, %34 : vector<8x1xf32>
    %36 = arith.negf %35 : vector<8x1xf32>
    %37 = math.exp %36 : vector<8x1xf32>
    %cst_22 = arith.constant 1.000000e+00 : f32
    %38 = vector.broadcast %cst_22 : f32 to vector<8x1xf32>
    %39 = arith.addf %38, %37 : vector<8x1xf32>
    %40 = arith.divf %38, %39 : vector<8x1xf32>
    %41 = vector.broadcast %21 : vector<8x1xf32> to vector<8x128xf32>
    %42 = arith.mulf %41, %0 : vector<8x128xf32>
    %43 = vector.broadcast %40 : vector<8x1xf32> to vector<8x128xf32>
    %44 = arith.mulf %43, %1 : vector<8x128xf32>
    %45 = arith.addf %42, %44 : vector<8x128xf32>
    %46 = arith.addf %45, %2 : vector<8x128xf32>
    %c0_23 = arith.constant 0 : index
    %c0_24 = arith.constant 0 : index
    %47 = vector.load %arg11[%c0_23, %c0_24] : memref<8x128xf32, #tpu.memory_space<vmem>>, vector<8x128xf32>
    tpu.vector_store %arg11[%c0_23, %c0_24], %46 {strides = array<i32>} : memref<8x128xf32, #tpu.memory_space<vmem>>, vector<8x128xf32>,
    return
  }
  func.func @transform_0(%arg0: i32) -> (i32, i32) {
    %c0_i32 = arith.constant 0 : i32
    %c0_i32_0 = arith.constant 0 : i32
    return %arg0, %c0_i32 : i32, i32
  }
  func.func @transform_1(%arg0: i32) -> (i32, i32) {
    %c0_i32 = arith.constant 0 : i32
    %c0_i32_0 = arith.constant 0 : i32
    return %arg0, %c0_i32 : i32, i32
  }
  func.func @transform_2(%arg0: i32) -> (i32, i32) {
    %c0_i32 = arith.constant 0 : i32
    %c0_i32_0 = arith.constant 0 : i32
    return %arg0, %c0_i32 : i32, i32
  }
  func.func @transform_3(%arg0: i32) -> (i32, i32) {
    %c0_i32 = arith.constant 0 : i32
    %c0_i32_0 = arith.constant 0 : i32
    %c0_i32_1 = arith.constant 0 : i32
    return %c0_i32, %c0_i32_0 : i32, i32
  }
  func.func @transform_4(%arg0: i32) -> (i32, i32) {
    %c0_i32 = arith.constant 0 : i32
    %c0_i32_0 = arith.constant 0 : i32
    %c0_i32_1 = arith.constant 0 : i32
    return %c0_i32, %c0_i32_0 : i32, i32
  }
  func.func @transform_5(%arg0: i32) -> (i32, i32) {
    %c0_i32 = arith.constant 0 : i32
    %c0_i32_0 = arith.constant 0 : i32
    %c0_i32_1 = arith.constant 0 : i32
    return %c0_i32, %c0_i32_0 : i32, i32
  }
  func.func @transform_6(%arg0: i32) -> (i32, i32) {
    %c0_i32 = arith.constant 0 : i32
    %c0_i32_0 = arith.constant 0 : i32
    %c0_i32_1 = arith.constant 0 : i32
    return %c0_i32, %c0_i32_0 : i32, i32
  }
  func.func @transform_7(%arg0: i32) -> (i32, i32) {
    %c0_i32 = arith.constant 0 : i32
    %c0_i32_0 = arith.constant 0 : i32
    %c0_i32_1 = arith.constant 0 : i32
    return %c0_i32, %c0_i32_0 : i32, i32
  }
  func.func @transform_8(%arg0: i32) -> (i32, i32) {
    %c0_i32 = arith.constant 0 : i32
    %c0_i32_0 = arith.constant 0 : i32
    %c0_i32_1 = arith.constant 0 : i32
    return %c0_i32, %c0_i32_0 : i32, i32
  }
  func.func @transform_9(%arg0: i32) -> i32 {
    %c0_i32 = arith.constant 0 : i32
    %c0_i32_0 = arith.constant 0 : i32
    return %c0_i32 : i32
  }
  func.func @transform_10(%arg0: i32) -> (i32, i32) {
    %c0_i32 = arith.constant 0 : i32
    %c0_i32_0 = arith.constant 0 : i32
    return %arg0, %c0_i32 : i32, i32
  }
}

</mosaic_0001>

<bundles_post_ra>
// kernel: tpu_custom_call.1
= control target key start
LH: loop header
LB: loop body
LE: loop exit
PB: predicated region body
PF: predicated region fallthrough
CT: control target
= control target key end

     0   :  { %15 = vsyncpa [#allocation3], 0  ;;  %s589_s0 = inlined_call_operand.hbm [shape: f32[8,128], index: 0, kind: input, shape index: {}]   ;;  %s590_s1 = inlined_call_operand.hbm [shape: f32[8,128], index: 1, kind: input, shape index: {}]   ;;  %s591_s2 = inlined_call_operand.hbm [shape: f32[8,128], index: 2, kind: input, shape index: {}]   ;;  %s592_s3 = inlined_call_operand.hbm [shape: f32[128,128], index: 3, kind: input, shape index: {}]   ;;  %s593_s4 = inlined_call_operand.vmem [shape: f32[1,128], index: 4, kind: input, shape index: {}]   ;;  %s594_s5 = inlined_call_operand.hbm [shape: f32[128,128], index: 5, kind: input, shape index: {}]   ;;  %s595_s6 = inlined_call_operand.vmem [shape: f32[1,128], index: 6, kind: input, shape index: {}]   ;;  %s596_s7 = inlined_call_operand.vmem [shape: f32[1,128], index: 7, kind: input, shape index: {}]   ;;  %s597_s8 = inlined_call_operand.vmem [shape: f32[1,128], index: 8, kind: input, shape index: {}]   ;;  %s598_s9 = inlined_call_operand.vmem [shape: f32[2], index: 9, kind: input, shape index: {}]   ;;  %s599_s10 = inlined_call_operand.hbm [shape: f32[8,128], index: 10, kind: output, shape index: {}]  }
   0x1   :  { %16 = vsyncpa [#allocation7], 0 }
   0x2   :  { %17 = vsyncpa [#allocation10], 0 }
   0x3   :  { %18 = vsyncpa [#allocation5], 0  ;;  %s36_s15 = sshll.u32 %s590_s1, 4  ;;  %s37_s15 = int_to_ptr.hbm [resolvable:$true] %s36_s15 }
   0x4   :  { %19 = vsyncpa [#allocation4], 0  ;;  %s479_s16 = smov [#allocation6]   ;;  %s57_s20 = sshll.u32 %s592_s3, 4  ;;  %s58_s20 = int_to_ptr.hbm [resolvable:$true] %s57_s20 }
   0x5   :  { %s38_s17 = sshll.u32 %s479_s16, 4  ;;  %s480_s21 = smov [#allocation9]   ;;  %s39_s17 = int_to_ptr.vmem [resolvable:$true] %s38_s17 }
   0x6   :  { %41 = dma.hbm_to_vmem [thread:$0]  %s37_s15, 128, %s39_s17, [#allocation7]  }
   0x7   :  { %s59_s22 = sshll.u32 %s480_s21, 4  ;;  %s481_s23 = smov 128   ;;  %s60_s22 = int_to_ptr.vmem [resolvable:$true] %s59_s22 }
   0x8   :  { %s482_s24 = smov 8   ;;  %s25_s1 = sshll.u32 %s589_s0, 4  ;;  %s26_s1 = int_to_ptr.hbm [resolvable:$true] %s25_s1 }
   0x9   :  { %65 = dma.hbm_to_vmem [thread:$0]  %s58_s20, 2048, %s60_s22, [#allocation10], %s481_s23, %s481_s23, %s482_s24  }
   0xa   :  { %s483_s27 = smov [#allocation2]   ;;  %s47_s3 = sshll.u32 %s591_s2, 4  ;;  %s48_s3 = int_to_ptr.hbm [resolvable:$true] %s47_s3 }
   0xb   :  { %s27_s28 = sshll.u32 %s483_s27, 4  ;;  %s484_s11 = smov [#allocation8]   ;;  %s28_s28 = int_to_ptr.vmem [resolvable:$true] %s27_s28 }
   0xc   :  { %30 = dma.hbm_to_vmem [thread:$0]  %s26_s1, 128, %s28_s28, [#allocation3]  }
   0xd   :  { %s49_s12 = sshll.u32 %s484_s11, 4  ;;  %s72_s15 = sshll.u32 %s594_s5, 4  ;;  %s50_s12 = int_to_ptr.vmem [resolvable:$true] %s49_s12  ;;  %s73_s15 = int_to_ptr.hbm [resolvable:$true] %s72_s15 }
   0xe   :  { %52 = dma.hbm_to_vmem [thread:$0]  %s48_s3, 128, %s50_s12, [#allocation7]  }
   0xf   :  { %s92_s17 = sshll.u32 %s598_s9, 4  ;;  %s485_s18 = smov [#allocation11]   ;;  %s93_s17 = int_to_ptr.vmem [resolvable:$true] %s92_s17 }
  0x10   :  { %s74_s19 = sshll.u32 %s485_s18, 4  ;;  %s486_s2 = smov [#allocation12]   ;;  %s75_s19 = int_to_ptr.vmem [resolvable:$true] %s74_s19 }
  0x11   :  { %80 = dma.hbm_to_vmem [thread:$0]  %s73_s15, 2048, %s75_s19, [#allocation10], %s481_s23, %s481_s23, %s482_s24  }
  0x12   :  { %95 = dma.vmem_to_smem %s93_s17, 16, %s486_s2, [#allocation5]  }
  0x13   :  { %469 = dma.done.wait [#allocation3], 128  }
  0x14   :  { %470 = vsyncadd [#allocation3], 4294967168 }
  0x15   :  { %471 = dma.done.wait [#allocation7], 256  }
  0x16   :  { %472 = vsyncadd [#allocation7], 4294967040 }
  0x17   :  { %473 = dma.done.wait [#allocation10], 4096  }
  0x18   :  { %474 = vsyncadd [#allocation10], 4294963200 }
  0x19   :  { %475 = dma.done.wait [#allocation5], 16  }
  0x1a   :  { %476 = vsyncadd [#allocation5], 4294967280 }
  0x1b   :  { %120 = sfence }
  0x1c   :  { %v140_v0 = vld [vmem:[#allocation9 + $0x78] sm:$0xff]  ;;  %v139_v1 = vld [vmem:[#allocation9 + $0x70] sm:$0xff]  ;;  %v138_v3 = vld [vmem:[#allocation9 + $0x68] sm:$0xff]  ;;  %s290_s26 = sld [smem:[#allocation12 + $0x1]]  ;;  %s276_s27 = sshll.u32 %s599_s10, 4  ;;  %s277_s27 = int_to_ptr.hbm [resolvable:$true] %s276_s27 }
  0x1d   :  { %145 = vmatpush.msra.mxu0 %v140_v0  ;;  %v210_v2 = vld [vmem:[#allocation11 + $0x78] sm:$0xff]  ;;  %v209_v4 = vld [vmem:[#allocation11 + $0x70] sm:$0xff]  ;;  %v208_v5 = vld [vmem:[#allocation11 + $0x68] sm:$0xff] }
  0x1e   :  { %215 = vmatpush.msra.mxu1 %v210_v2  ;;  %v137_v6 = vld [vmem:[#allocation9 + $0x60] sm:$0xff]  ;;  %v136_v8 = vld [vmem:[#allocation9 + $0x58] sm:$0xff]  ;;  %v135_v10 = vld [vmem:[#allocation9 + $0x50] sm:$0xff] }
  0x1f   :  { %146 = vmatpush.msra.mxu0 %v139_v1  ;;  %v207_v7 = vld [vmem:[#allocation11 + $0x60] sm:$0xff]  ;;  %v206_v9 = vld [vmem:[#allocation11 + $0x58] sm:$0xff]  ;;  %v205_v11 = vld [vmem:[#allocation11 + $0x50] sm:$0xff] }
  0x20   :  { %216 = vmatpush.msra.mxu1 %v209_v4  ;;  %v134_v12 = vld [vmem:[#allocation9 + $0x48] sm:$0xff]  ;;  %v133_v14 = vld [vmem:[#allocation9 + $0x40] sm:$0xff]  ;;  %v132_v16 = vld [vmem:[#allocation9 + $0x38] sm:$0xff] }
  0x21   :  { %147 = vmatpush.msra.mxu0 %v138_v3  ;;  %v204_v13 = vld [vmem:[#allocation11 + $0x48] sm:$0xff]  ;;  %v203_v15 = vld [vmem:[#allocation11 + $0x40] sm:$0xff]  ;;  %v202_v17 = vld [vmem:[#allocation11 + $0x38] sm:$0xff] }
  0x22   :  { %217 = vmatpush.msra.mxu1 %v208_v5  ;;  %v131_v18 = vld [vmem:[#allocation9 + $0x30] sm:$0xff]  ;;  %v130_v20 = vld [vmem:[#allocation9 + $0x28] sm:$0xff]  ;;  %v129_v22 = vld [vmem:[#allocation9 + $0x20] sm:$0xff]  ;;  %v243_v51 = vstv %s290_s26 }
  0x23   :  { %148 = vmatpush.msra.mxu0 %v137_v6  ;;  %v201_v19 = vld [vmem:[#allocation11 + $0x30] sm:$0xff]  ;;  %v200_v21 = vld [vmem:[#allocation11 + $0x28] sm:$0xff]  ;;  %v199_v23 = vld [vmem:[#allocation11 + $0x20] sm:$0xff] }
  0x24   :  { %218 = vmatpush.msra.mxu1 %v207_v7  ;;  %v128_v24 = vld [vmem:[#allocation9 + $0x18] sm:$0xff]  ;;  %v127_v26 = vld [vmem:[#allocation9 + $0x10] sm:$0xff]  ;;  %v561_v27 = vld [vmem:[#allocation2] sm:$0xff] }
  0x25   :  { %149 = vmatpush.msra.mxu0 %v136_v8  ;;  %v198_v25 = vld [vmem:[#allocation11 + $0x18] sm:$0xff]  ;;  %v197_v29 = vld [vmem:[#allocation11 + $0x10] sm:$0xff]  ;;  %v126_v30 = vld [vmem:[#allocation9 + $0x8] sm:$0xff] }
  0x26   :  { %219 = vmatpush.msra.mxu1 %v206_v9  ;;  %v563_v28 = vld [vmem:[#allocation8] sm:$0xff]  ;;  %v565_v31 = vld [vmem:[#allocation6] sm:$0xff]  ;;  %v196_v32 = vld [vmem:[#allocation11 + $0x8] sm:$0xff] }
  0x27   :  { %150 = vmatpush.msra.mxu0 %v135_v10  ;;  %v125_v33 = vld [vmem:[#allocation9] sm:$0xff]  ;;  %v124_v34 = vadd.f32 %v563_v28, %v561_v27  ;;  %v194_v36 = vadd.f32 %v563_v28, %v565_v31  ;;  %v301_v37 = vld [vmem:[%s593_s4] ss:$0 sm:$0xff]  ;;  %s172_s4 = sld [smem:[#allocation12]] }
  0x28   :  { %220 = vmatpush.msra.mxu1 %v205_v11  ;;  %v195_v35 = vld [vmem:[#allocation11] sm:$0xff]  ;;  %v302_v38 = vld [vmem:[%s596_s7] ss:$0 sm:$0xff] }
  0x29   :  { %151 = vmatpush.msra.mxu0 %v134_v12  ;;  %v303_v41 = vld [vmem:[%s595_s6] ss:$0 sm:$0xff]  ;;  %s487_s6 = smov [#allocation13]  }
  0x2a   :  { %221 = vmatpush.msra.mxu1 %v204_v13  ;;  %v304_v45 = vld [vmem:[%s597_s8] ss:$0 sm:$0xff]  ;;  %s274_s7 = sshll.u32 %s487_s6, 4  ;;  %s275_s7 = int_to_ptr.vmem [resolvable:$true] %s274_s7 }
  0x2b   :  { %152 = vmatpush.msra.mxu0 %v133_v14 }
  0x2c   :  { %222 = vmatpush.msra.mxu1 %v203_v15 }
  0x2d   :  { %153 = vmatpush.msra.mxu0 %v132_v16  ;;  %v173_v47 = vstv %s172_s4 }
  0x2e   :  { %223 = vmatpush.msra.mxu1 %v202_v17 }
  0x2f   :  { %154 = vmatpush.msra.mxu0 %v131_v18 }
  0x30   :  { %224 = vmatpush.msra.mxu1 %v201_v19 }
  0x31   :  { %155 = vmatpush.msra.mxu0 %v130_v20 }
  0x32   :  { %225 = vmatpush.msra.mxu1 %v200_v21 }
  0x33   :  { %156 = vmatpush.msra.mxu0 %v129_v22 }
  0x34   :  { %226 = vmatpush.msra.mxu1 %v199_v23 }
  0x35   :  { %157 = vmatpush.msra.mxu0 %v128_v24 }
  0x36   :  { %227 = vmatpush.msra.mxu1 %v198_v25 }
  0x37   :  { %158 = vmatpush.msra.mxu0 %v127_v26 }
  0x38   :  { %228 = vmatpush.msra.mxu1 %v197_v29 }
  0x39   :  { %159 = vmatpush.msra.mxu0 %v126_v30 }
  0x3a   :  { %229 = vmatpush.msra.mxu1 %v196_v32 }
  0x3b   :  { %160 = vmatpush.msra.mxu0 %v125_v33 }
  0x3c   :  { %161 = vmatmul.f32.vlgmr.msra.gmra.mxu0 %v124_v34  ;;  %230 = vmatpush.msra.mxu1 %v195_v35 }
  0x3d   :  { %231 = vmatmul.f32.vlgmr.msra.gmra.mxu1 %v194_v36 }
  0xb9   :  { %v162_v39 = vpop.f32.mrf.mxu0 }
  0xba   :  { %v163_v40 = vadd.f32 %v301_v37, %v162_v39  ;;  %v232_v42 = vpop.f32.mrf.mxu1 }
  0xbb   :  { %v233_v44 = vadd.f32 %v303_v41, %v232_v42 }
  0xbc   :  { %v169_v43 = vmul.f32 %v302_v38, %v163_v40 }
  0xbd   :  { %v239_v46 = vmul.f32 %v304_v45, %v233_v44 }
  0xbe   :  { %170 = vadd.xlane.f32.xlu0 %v169_v43 }
  0xc6   :  { %240 = vadd.xlane.f32.xlu0 %v239_v46 }
 0x131   :  { %v171_v48 = vpop.xlane.xlu0 %170 }
 0x132   :  { %v174_v49 = vadd.f32 %v173_v47, %v171_v48 }
 0x134   :  { %v289_v50 = vmul.f32 -1.442695, %v174_v49 }
 0x136   :  { %305 = vpow2.f32 %v289_v50 }
 0x139   :  { %v241_v52 = vpop.xlane.xlu0 %240 }
 0x13a   :  { %v244_v53 = vadd.f32 %v243_v51, %v241_v52 }
 0x13c   :  { %v306_v54 = vpop.eup %305  ;;  %v291_v55 = vmul.f32 -1.442695, %v244_v53 }
 0x13d   :  { %v178_v56 = vadd.f32 1.0, %v306_v54 }
 0x13e   :  { %307 = vpow2.f32 %v291_v55 }
 0x13f   :  { %309 = vrcp.f32 %v178_v56  ;;  %v190_v2 = vand.u32 2147483648, %v178_v56  ;;  %vm184_vm1 = vweird.f32 %v178_v56  ;;  %v188_v4 = vand.u32 2147483647, %v178_v56 }
 0x141   :  { %v191_v9 = vor.u32 1.1754944e-38, %v190_v2  ;;  %vm189_vm4 = vcmp.eq.f32.partialorder %v188_v4, 8.507059e+37 }
 0x144   :  { %v308_v57 = vpop.eup %307 }
 0x145   :  { %v310_v58 = vpop.eup %309  ;;  %v248_v59 = vadd.f32 1.0, %v308_v57 }
 0x146   :  { %v180_v60 = vmul.f32 %v310_v58, %v178_v56  ;;  %vm185_vm0 = vweird.f32 %v310_v58 }
 0x147   :  { %311 = vrcp.f32 %v248_v59  ;;  %vm186_vm2 = vmor %vm184_vm1, %vm185_vm0  ;;  %v260_v5 = vand.u32 2147483648, %v248_v59  ;;  %v258_v8 = vand.u32 2147483647, %v248_v59  ;;  %vm254_vm5 = vweird.f32 %v248_v59 }
 0x148   :  { %v181_v61 = vsub.f32 1.0, %v180_v60 }
 0x149   :  { %v261_v12 = vor.u32 1.1754944e-38, %v260_v5  ;;  %vm259_vm7 = vcmp.eq.f32.partialorder %v258_v8, 8.507059e+37 }
 0x14a   :  { %v182_v62 = vmul.f32 %v310_v58, %v181_v61 }
 0x14c   :  { %v183_v1 = vadd.f32 %v310_v58, %v182_v62 }
 0x14d   :  { %v312_v63 = vpop.eup %311 }
 0x14e   :  { %v250_v0 = vmul.f32 %v312_v63, %v248_v59  ;;  %v187_v6 = vsel %vm186_vm2, %v310_v58, %v183_v1  ;;  %vm255_vm3 = vweird.f32 %v312_v63 }
 0x14f   :  { %v192_v11 = vsel %vm189_vm4, %v191_v9, %v187_v6  ;;  %vm256_vm6 = vmor %vm254_vm5, %vm255_vm3 }
 0x150   :  { %v251_v3 = vsub.f32 1.0, %v250_v0  ;;  %v264_v15 = vmul.f32 %v192_v11, %v561_v27 }
 0x152   :  { %v252_v7 = vmul.f32 %v312_v63, %v251_v3 }
 0x154   :  { %v253_v10 = vadd.f32 %v312_v63, %v252_v7 }
 0x156   :  { %v257_v13 = vsel %vm256_vm6, %v312_v63, %v253_v10 }
 0x157   :  { %v262_v14 = vsel %vm259_vm7, %v261_v12, %v257_v13 }
 0x158   :  { %v265_v16 = vmul.f32 %v262_v14, %v565_v31 }
 0x15a   :  { %v266_v17 = vadd.f32 %v265_v16, %v264_v15 }
 0x15c   :  { %v267_v18 = vadd.f32 %v266_v17, %v563_v28 }
 0x15e   :  { %268 = vst [vmem:[#allocation13] sm:$0xff] %v267_v18 }
 0x15f   :  { %279 = dma.vmem_to_hbm [thread:$0]  %s275_s7, 128, %s277_s27, [#allocation4]  }
 0x160   :  { %477 = dma.done.wait [#allocation4], 128  }
 0x161   :  { %478 = vsyncadd [#allocation4], 4294967168 }
 0x162   :  { %284 = vsyncpa [#allocation3], 1 }
 0x163   :  { %285 = vsyncpa [#allocation7], 1 }
 0x164   :  { %286 = vsyncpa [#allocation10], 1 }
 0x165   :  { %287 = vsyncpa [#allocation4], 1 }
 0x166   :  { %288 = vsyncpa [#allocation5], 1 }

</bundles_post_ra>
